<compile_context>
chip_gen: v7x
topology: tpu7x:2x2x1
jax: 0.10.0
libtpu: 0.0.40
codegen_flags: <defaults>
</compile_context>

<pallas_src>
import math

import jax
import jax.numpy as jnp
from jax.experimental import pallas as pl
from jax.experimental.pallas import tpu as pltpu

_LANE = 128


def _round_up(x, m):
    return ((x + m - 1) // m) * m


def _leaky_relu(h, negative_slope=0.01):
    # Equivalent to where(h > 0, h, a*h) for 0 < a < 1; mul+max instead of cmp+sel.
    return jnp.maximum(h, negative_slope * h)


def _mlp_kernel(x_ref, w1_ref, b1_ref, w2_ref, b2_ref, w3_ref, b3_ref, o_ref):
    cdt = w1_ref.dtype  # compute dtype for MXU inputs (bf16 by default)
    # In-kernel cast of the streamed f32 activations (VPU; saves a wrapper pass).
    x = x_ref[...].astype(cdt)
    # Layer 1: (TB, in) @ (in, Hp) -> f32 accumulate on the MXU.
    h = jnp.dot(x, w1_ref[...], preferred_element_type=jnp.float32)
    h = _leaky_relu(h + b1_ref[...])
    # Layer 2: (TB, Hp) @ (Hp, Hp)
    h = jnp.dot(h.astype(cdt), w2_ref[...], preferred_element_type=jnp.float32)
    h = _leaky_relu(h + b2_ref[...])
    # Layer 3 (+ activation_last): (TB, Hp) @ (Hp, Op) padded, then store only
    # the unpadded output_dim lanes in the (narrow) output dtype.
    h = jnp.dot(h.astype(cdt), w3_ref[...], preferred_element_type=jnp.float32)
    h = _leaky_relu(h + b3_ref[...])
    o_ref[...] = h[:, : o_ref.shape[-1]].astype(o_ref.dtype)


def embedding_feedforward(x, params, input_shape, output_shape, *,
                          batch_tile=8192,
                          compute_dtype=jnp.bfloat16,
                          out_dtype=jnp.bfloat16):
    """Forward pass. x: any shape whose trailing dims flatten to prod(input_shape)."""
    input_dim = int(math.prod(input_shape))
    output_dim = int(math.prod(output_shape))
    w1, b1, w2, b2, w3, b3 = params
    H = w1.shape[1]

    # --- lane-pad hidden / layer-3-output feature dims; weights stay VMEM-resident.
    Hp = _round_up(H, _LANE)
    Op = _round_up(output_dim, _LANE)

    def pad2(a, rows, cols):
        return jnp.pad(a, ((0, rows - a.shape[0]), (0, cols - a.shape[1])))

    w1p = pad2(w1, input_dim, Hp).astype(compute_dtype)
    w2p = pad2(w2, Hp, Hp).astype(compute_dtype)
    w3p = pad2(w3, Hp, Op).astype(compute_dtype)
    b1p = pad2(b1, 1, Hp).astype(jnp.float32)
    b2p = pad2(b2, 1, Hp).astype(jnp.float32)
    b3p = pad2(b3, 1, Op).astype(jnp.float32)

    # --- activations: flatten view (free), stream as f32 (cast happens in-kernel).
    x2d = jnp.reshape(x, (-1, input_dim)).astype(jnp.float32)
    B = x2d.shape[0]

    # --- batch tiling: multiple of 16, aim for >= 4 grid steps when B allows.
    batch_tile = max(16, _round_up(int(batch_tile), 16))
    TB = min(batch_tile, max(16, _round_up(-(-B // 4), 16)))
    if TB >= B:
        TB = B                       # single full-array block (tiny batches)
    grid = (pl.cdiv(B, TB),)         # no batch padding; tail block is masked

    out_itemsize = jnp.dtype(out_dtype).itemsize
    c_itemsize = jnp.dtype(compute_dtype).itemsize

    # Scheduler hint from UNPADDED dims and real dtypes.
    w_bytes = (input_dim * Hp + Hp * Hp + Hp * Op) * c_itemsize
    cost = pl.CostEstimate(
        flops=2 * B * (input_dim * H + H * H + H * output_dim),
        transcendentals=0,
        bytes_accessed=B * input_dim * 4 + B * output_dim * out_itemsize + w_bytes,
    )

    # Rough per-step VMEM: double-buffered x/out blocks + f32 intermediates.
    step_bytes = TB * (2 * input_dim * 4          # x blocks (x2 buffers)
                       + 2 * _LANE * out_itemsize  # out blocks (lane-padded in VMEM)
                       + 3 * Hp * 4)               # f32/bf16 intermediates (approx)
    vmem_limit = int(min(100 * 2**20, max(32 * 2**20, step_bytes * 3 // 2)))

    out = pl.pallas_call(
        _mlp_kernel,
        out_shape=jax.ShapeDtypeStruct((B, output_dim), out_dtype),
        grid=grid,
        in_specs=[
            pl.BlockSpec((TB, input_dim), lambda i: (i, 0)),   # streamed f32 activations
            pl.BlockSpec((input_dim, Hp), lambda i: (0, 0)),   # resident weights/biases
            pl.BlockSpec((1, Hp), lambda i: (0, 0)),
            pl.BlockSpec((Hp, Hp), lambda i: (0, 0)),
            pl.BlockSpec((1, Hp), lambda i: (0, 0)),
            pl.BlockSpec((Hp, Op), lambda i: (0, 0)),
            pl.BlockSpec((1, Op), lambda i: (0, 0)),
        ],
        # Unpadded, contiguous-per-tile output stream (32 B/row at bf16).
        out_specs=pl.BlockSpec((TB, output_dim), lambda i: (i, 0)),
        compiler_params=pltpu.CompilerParams(
            dimension_semantics=("parallel",),
            vmem_limit_bytes=vmem_limit,
        ),
        cost_estimate=cost,
    )(x2d, w1p, b1p, w2p, b2p, w3p, b3p)

    return jnp.reshape(out, (-1,) + tuple(output_shape))


def init_params(key, input_dim, hidden_dim, output_dim):
    """Deterministic init matching nn.Linear default (uniform +/- 1/sqrt(fan_in)).
    Weights stored as (in_features, out_features)."""
    ks = jax.random.split(key, 6)

    def linear(kw, kb, fan_in, fan_out):
        bound = 1.0 / math.sqrt(fan_in)
        w = jax.random.uniform(kw, (fan_in, fan_out), jnp.float32, -bound, bound)
        b = jax.random.uniform(kb, (1, fan_out), jnp.float32, -bound, bound)
        return w, b

    w1, b1 = linear(ks[0], ks[1], input_dim, hidden_dim)
    w2, b2 = linear(ks[2], ks[3], hidden_dim, hidden_dim)
    w3, b3 = linear(ks[4], ks[5], hidden_dim, output_dim)
    return (w1, b1, w2, b2, w3, b3)


def reference_forward(x, params, input_shape, output_shape):
    """Pure-JAX f32 reference of the same forward pass."""
    input_dim = int(math.prod(input_shape))
    w1, b1, w2, b2, w3, b3 = params
    hi = jax.lax.Precision.HIGHEST
    h = jnp.reshape(x, (-1, input_dim)).astype(jnp.float32)
    h = _leaky_relu(jnp.dot(h, w1, precision=hi) + b1)
    h = _leaky_relu(jnp.dot(h, w2, precision=hi) + b2)
    h = _leaky_relu(jnp.dot(h, w3, precision=hi) + b3)
    return jnp.reshape(h, (-1,) + tuple(output_shape))


if __name__ == "__main__":
    # Module config: input_shape=(4, 8) -> input_dim=32, output_shape=(16,)
    # num_layers=3, hidden_dim defaults to (32+16)//2 = 24.
    input_shape = (4, 8)
    output_shape = (16,)
    input_dim = int(math.prod(input_shape))
    output_dim = int(math.prod(output_shape))
    hidden_dim = (input_dim + output_dim) // 2

    key = jax.random.PRNGKey(0)
    k_params, k_x, k_x2 = jax.random.split(key, 3)
    params = init_params(k_params, input_dim, hidden_dim, output_dim)

    # 1) Small batch, default fast path (bf16 compute + bf16 output, single block).
    batch = 2
    x = jax.random.normal(k_x, (batch,) + input_shape, jnp.float32)
    out = jax.block_until_ready(
        embedding_feedforward(x, params, input_shape, output_shape))
    ref = reference_forward(x, params, input_shape, output_shape)
    assert out.shape == (batch,) + output_shape, out.shape
    assert jnp.allclose(out.astype(jnp.float32), ref, atol=5e-2, rtol=5e-2), \
        "mismatch vs reference (small, bf16)"

    # 2) Larger batch: multi-tile grid (4 steps) + partial tail block, full-f32 path.
    batch2 = 200
    x2 = jax.random.normal(k_x2, (batch2,) + input_shape, jnp.float32)
    out2 = jax.block_until_ready(
        embedding_feedforward(x2, params, input_shape, output_shape,
                              batch_tile=64,
                              compute_dtype=jnp.float32, out_dtype=jnp.float32))
    ref2 = reference_forward(x2, params, input_shape, output_shape)
    assert out2.shape == (batch2,) + output_shape, out2.shape
    assert jnp.allclose(out2, ref2, atol=1e-3, rtol=1e-3), \
        "mismatch vs reference (tiled, f32)"

    # 3) Same multi-tile grid on the default bf16 fast path.
    out3 = jax.block_until_ready(
        embedding_feedforward(x2, params, input_shape, output_shape, batch_tile=64))
    assert out3.shape == (batch2,) + output_shape, out3.shape
    assert jnp.allclose(out3.astype(jnp.float32), ref2, atol=5e-2, rtol=5e-2), \
        "mismatch vs reference (tiled, bf16)"

    # TODO(synk): input_is_one_hot_index=True path (scatter one-hot build) is plain
    # JAX glue (jax.nn.one_hot) outside the kernel and is not exercised here.
    print("KERNEL_OK")
</pallas_src>

<mosaic_0001>
module attributes {stable_mosaic.version = 11 : i64} {
  func.func @_mlp_kernel(%arg0: i32, %arg1: memref<2x32xf32, #tpu.memory_space<vmem>>, %arg2: memref<32x128xbf16, #tpu.memory_space<vmem>>, %arg3: memref<1x128xf32, #tpu.memory_space<vmem>>, %arg4: memref<128x128xbf16, #tpu.memory_space<vmem>>, %arg5: memref<1x128xf32, #tpu.memory_space<vmem>>, %arg6: memref<128x128xbf16, #tpu.memory_space<vmem>>, %arg7: memref<1x128xf32, #tpu.memory_space<vmem>>, %arg8: memref<2x16xbf16, #tpu.memory_space<vmem>>) attributes {dimension_semantics = [#tpu.dimension_semantics<parallel>], iteration_bounds = array<i64: 1>, scalar_prefetch = 0 : i64, scratch_operands = 0 : i64, tpu.core_type = #tpu.core_type<tc>, window_params = [{transform_indices = @transform_0, window_bounds = array<i64: 2, 32>}, {pipeline_mode = #tpu.pipeline_mode<synchronous>, transform_indices = @transform_1, window_bounds = array<i64: 32, 128>}, {pipeline_mode = #tpu.pipeline_mode<synchronous>, transform_indices = @transform_2, window_bounds = array<i64: 1, 128>}, {pipeline_mode = #tpu.pipeline_mode<synchronous>, transform_indices = @transform_3, window_bounds = array<i64: 128, 128>}, {pipeline_mode = #tpu.pipeline_mode<synchronous>, transform_indices = @transform_4, window_bounds = array<i64: 1, 128>}, {pipeline_mode = #tpu.pipeline_mode<synchronous>, transform_indices = @transform_5, window_bounds = array<i64: 128, 128>}, {pipeline_mode = #tpu.pipeline_mode<synchronous>, transform_indices = @transform_6, window_bounds = array<i64: 1, 128>}, {transform_indices = @transform_7, window_bounds = array<i64: 2, 16>}]} {
    %c0 = arith.constant 0 : index
    %c0_0 = arith.constant 0 : index
    %0 = vector.load %arg1[%c0, %c0_0] : memref<2x32xf32, #tpu.memory_space<vmem>>, vector<2x32xf32>
    %1 = arith.truncf %0 : vector<2x32xf32> to vector<2x32xbf16>
    %c0_1 = arith.constant 0 : index
    %c0_2 = arith.constant 0 : index
    %2 = vector.load %arg2[%c0_1, %c0_2] : memref<32x128xbf16, #tpu.memory_space<vmem>>, vector<32x128xbf16>
    %cst = arith.constant dense<0.000000e+00> : vector<2x128xf32>
    %3 = tpu.matmul %1, %2, %cst {dimension_numbers = #tpu.dot_dimension_numbers<[1], [0], [0], [1], [0, 0, 1, 1], [], []>} : vector<2x32xbf16>, vector<32x128xbf16>, vector<2x128xf32> -> vector<2x128xf32>
    %c0_3 = arith.constant 0 : index
    %c0_4 = arith.constant 0 : index
    %4 = vector.load %arg3[%c0_3, %c0_4] : memref<1x128xf32, #tpu.memory_space<vmem>>, vector<1x128xf32>
    %5 = vector.broadcast %4 : vector<1x128xf32> to vector<2x128xf32>
    %6 = arith.addf %3, %5 : vector<2x128xf32>
    %cst_5 = arith.constant 0.00999999977 : f32
    %7 = vector.broadcast %cst_5 : f32 to vector<2x128xf32>
    %8 = arith.mulf %7, %6 : vector<2x128xf32>
    %9 = arith.maximumf %6, %8 : vector<2x128xf32>
    %10 = arith.truncf %9 : vector<2x128xf32> to vector<2x128xbf16>
    %c0_6 = arith.constant 0 : index
    %c0_7 = arith.constant 0 : index
    %11 = vector.load %arg4[%c0_6, %c0_7] : memref<128x128xbf16, #tpu.memory_space<vmem>>, vector<128x128xbf16>
    %cst_8 = arith.constant dense<0.000000e+00> : vector<2x128xf32>
    %12 = tpu.matmul %10, %11, %cst_8 {dimension_numbers = #tpu.dot_dimension_numbers<[1], [0], [0], [1], [0, 0, 1, 1], [], []>} : vector<2x128xbf16>, vector<128x128xbf16>, vector<2x128xf32> -> vector<2x128xf32>
    %c0_9 = arith.constant 0 : index
    %c0_10 = arith.constant 0 : index
    %13 = vector.load %arg5[%c0_9, %c0_10] : memref<1x128xf32, #tpu.memory_space<vmem>>, vector<1x128xf32>
    %14 = vector.broadcast %13 : vector<1x128xf32> to vector<2x128xf32>
    %15 = arith.addf %12, %14 : vector<2x128xf32>
    %cst_11 = arith.constant 0.00999999977 : f32
    %16 = vector.broadcast %cst_11 : f32 to vector<2x128xf32>
    %17 = arith.mulf %16, %15 : vector<2x128xf32>
    %18 = arith.maximumf %15, %17 : vector<2x128xf32>
    %19 = arith.truncf %18 : vector<2x128xf32> to vector<2x128xbf16>
    %c0_12 = arith.constant 0 : index
    %c0_13 = arith.constant 0 : index
    %20 = vector.load %arg6[%c0_12, %c0_13] : memref<128x128xbf16, #tpu.memory_space<vmem>>, vector<128x128xbf16>
    %cst_14 = arith.constant dense<0.000000e+00> : vector<2x128xf32>
    %21 = tpu.matmul %19, %20, %cst_14 {dimension_numbers = #tpu.dot_dimension_numbers<[1], [0], [0], [1], [0, 0, 1, 1], [], []>} : vector<2x128xbf16>, vector<128x128xbf16>, vector<2x128xf32> -> vector<2x128xf32>
    %c0_15 = arith.constant 0 : index
    %c0_16 = arith.constant 0 : index
    %22 = vector.load %arg7[%c0_15, %c0_16] : memref<1x128xf32, #tpu.memory_space<vmem>>, vector<1x128xf32>
    %23 = vector.broadcast %22 : vector<1x128xf32> to vector<2x128xf32>
    %24 = arith.addf %21, %23 : vector<2x128xf32>
    %cst_17 = arith.constant 0.00999999977 : f32
    %25 = vector.broadcast %cst_17 : f32 to vector<2x128xf32>
    %26 = arith.mulf %25, %24 : vector<2x128xf32>
    %27 = arith.maximumf %24, %26 : vector<2x128xf32>
    %28 = vector.extract_strided_slice %27 {offsets = [0, 0], sizes = [2, 16], strides = [1, 1]} : vector<2x128xf32> to vector<2x16xf32>
    %29 = arith.truncf %28 : vector<2x16xf32> to vector<2x16xbf16>
    %c0_18 = arith.constant 0 : index
    %c0_19 = arith.constant 0 : index
    %30 = vector.load %arg8[%c0_18, %c0_19] : memref<2x16xbf16, #tpu.memory_space<vmem>>, vector<2x16xbf16>
    tpu.vector_store %arg8[%c0_18, %c0_19], %29 {strides = array<i32>} : memref<2x16xbf16, #tpu.memory_space<vmem>>, vector<2x16xbf16>,
    return
  }
  func.func @transform_0(%arg0: i32) -> (i32, i32) {
    %c0_i32 = arith.constant 0 : i32
    %c0_i32_0 = arith.constant 0 : i32
    return %arg0, %c0_i32 : i32, i32
  }
  func.func @transform_1(%arg0: i32) -> (i32, i32) {
    %c0_i32 = arith.constant 0 : i32
    %c0_i32_0 = arith.constant 0 : i32
    %c0_i32_1 = arith.constant 0 : i32
    return %c0_i32, %c0_i32_0 : i32, i32
  }
  func.func @transform_2(%arg0: i32) -> (i32, i32) {
    %c0_i32 = arith.constant 0 : i32
    %c0_i32_0 = arith.constant 0 : i32
    %c0_i32_1 = arith.constant 0 : i32
    return %c0_i32, %c0_i32_0 : i32, i32
  }
  func.func @transform_3(%arg0: i32) -> (i32, i32) {
    %c0_i32 = arith.constant 0 : i32
    %c0_i32_0 = arith.constant 0 : i32
    %c0_i32_1 = arith.constant 0 : i32
    return %c0_i32, %c0_i32_0 : i32, i32
  }
  func.func @transform_4(%arg0: i32) -> (i32, i32) {
    %c0_i32 = arith.constant 0 : i32
    %c0_i32_0 = arith.constant 0 : i32
    %c0_i32_1 = arith.constant 0 : i32
    return %c0_i32, %c0_i32_0 : i32, i32
  }
  func.func @transform_5(%arg0: i32) -> (i32, i32) {
    %c0_i32 = arith.constant 0 : i32
    %c0_i32_0 = arith.constant 0 : i32
    %c0_i32_1 = arith.constant 0 : i32
    return %c0_i32, %c0_i32_0 : i32, i32
  }
  func.func @transform_6(%arg0: i32) -> (i32, i32) {
    %c0_i32 = arith.constant 0 : i32
    %c0_i32_0 = arith.constant 0 : i32
    %c0_i32_1 = arith.constant 0 : i32
    return %c0_i32, %c0_i32_0 : i32, i32
  }
  func.func @transform_7(%arg0: i32) -> (i32, i32) {
    %c0_i32 = arith.constant 0 : i32
    %c0_i32_0 = arith.constant 0 : i32
    return %arg0, %c0_i32 : i32, i32
  }
}

</mosaic_0001>

<bundles_post_ra>
// kernel: tpu_custom_call.1
= control target key start
LH: loop header
LB: loop body
LE: loop exit
PB: predicated region body
PF: predicated region fallthrough
CT: control target
= control target key end

     0   :  { %12 = vsyncpa [#allocation3], 0  ;;  %s787_s0 = inlined_call_operand.hbm [shape: f32[2,32], index: 0, kind: input, shape index: {}]   ;;  %s788_s1 = inlined_call_operand.hbm [shape: bf16[32,128], index: 1, kind: input, shape index: {}]   ;;  %s789_s2 = inlined_call_operand.vmem [shape: f32[1,128], index: 2, kind: input, shape index: {}]   ;;  %s790_s3 = inlined_call_operand.hbm [shape: bf16[128,128], index: 3, kind: input, shape index: {}]   ;;  %s791_s4 = inlined_call_operand.vmem [shape: f32[1,128], index: 4, kind: input, shape index: {}]   ;;  %s792_s5 = inlined_call_operand.hbm [shape: bf16[128,128], index: 5, kind: input, shape index: {}]   ;;  %s793_s6 = inlined_call_operand.vmem [shape: f32[1,128], index: 6, kind: input, shape index: {}]   ;;  %s794_s7 = inlined_call_operand.hbm [shape: bf16[2,16], index: 7, kind: output, shape index: {}]  }
   0x1   :  { %13 = vsyncpa [#allocation6], 0 }
   0x2   :  { %14 = vsyncpa [#allocation9], 0 }
   0x3   :  { %15 = vsyncpa [#allocation4], 0  ;;  %s636_s24 = smov [#allocation5]   ;;  %s518_s28 = scalar_lea.hbm %s788_s1, 256 }
   0x4   :  { %s31_s25 = sshll.u32 %s636_s24, 4  ;;  %p519_p0 = scmp.ne.s32.totalorder %s788_s1, %s518_s28  ;;  %s32_s25 = int_to_ptr.vmem [resolvable:$true] %s31_s25 }
   0x5   :  { %p522_p1 = scmp.lt.u32.totalorder %s518_s28, %s788_s1 }
   0x7   :  { %p524_p2 = pnand %p522_p1, %p519_p0 }
   0x9   :  { %527 = shalt.err (!%p524_p2)
}
   0xa   :  { %s528_s10 = scalar_lea.vmem %s32_s25, 256  ;;  %p533_p4 = scmp.lt.s32.totalorder %s32_s25, %s32_s25 }
   0xb   :  { %p529_p3 = scmp.ne.s32.totalorder %s32_s25, %s528_s10  ;;  %p534_p5 = scmp.lt.s32.totalorder %s528_s10, %s528_s10 }
   0xd   :  { %p535_p6 = por %p534_p5, %p533_p4 }
   0xf   :  { %p536_p7 = pnand %p535_p6, %p529_p3 }
  0x11   :  { %539 = shalt.err (!%p536_p7)
}
  0x12   :  { %s637_s11 = smov 64   ;;  %s638_s12 = smov 4  }
  0x13   :  { %37 = dma.hbm_to_vmem [thread:$0]  %s788_s1, 256, %s32_s25, [#allocation6], %s637_s11, %s637_s11, %s638_s12  }
  0x14   :  { %s639_s15 = smov [#allocation2]   ;;  %s640_s17 = smov [#allocation7]  }
  0x15   :  { %s22_s16 = sshll.u32 %s639_s15, 4  ;;  %s45_s18 = sshll.u32 %s640_s17, 4  ;;  %s23_s16 = int_to_ptr.vmem [resolvable:$true] %s22_s16  ;;  %s46_s18 = int_to_ptr.vmem [resolvable:$true] %s45_s18 }
  0x16   :  { %s540_s21 = scalar_lea.hbm %s787_s0, 32 }
  0x17   :  { %p541_p8 = scmp.ne.s32.totalorder %s787_s0, %s540_s21  ;;  %p544_p9 = scmp.lt.u32.totalorder %s540_s21, %s787_s0 }
  0x19   :  { %p546_p10 = pnand %p544_p9, %p541_p8 }
  0x1b   :  { %549 = shalt.err (!%p546_p10)
}
  0x1c   :  { %s550_s1 = scalar_lea.vmem %s23_s16, 32  ;;  %p555_p12 = scmp.lt.s32.totalorder %s23_s16, %s23_s16 }
  0x1d   :  { %p551_p11 = scmp.ne.s32.totalorder %s23_s16, %s550_s1  ;;  %p556_p13 = scmp.lt.s32.totalorder %s550_s1, %s550_s1 }
  0x1f   :  { %p557_p0 = por %p556_p13, %p555_p12 }
  0x21   :  { %p558_p1 = pnand %p557_p0, %p551_p11 }
  0x23   :  { %561 = shalt.err (!%p558_p1)
}
  0x24   :  { %25 = dma.hbm_to_vmem [thread:$0]  %s787_s0, 32, %s23_s16, [#allocation3]  }
  0x25   :  { %s562_s30 = scalar_lea.hbm %s790_s3, 1024 }
  0x26   :  { %p563_p2 = scmp.ne.s32.totalorder %s790_s3, %s562_s30  ;;  %p566_p3 = scmp.lt.u32.totalorder %s562_s30, %s790_s3 }
  0x28   :  { %p568_p4 = pnand %p566_p3, %p563_p2 }
  0x2a   :  { %571 = shalt.err (!%p568_p4)
}
  0x2b   :  { %s572_s14 = scalar_lea.vmem %s46_s18, 1024  ;;  %p577_p6 = scmp.lt.s32.totalorder %s46_s18, %s46_s18 }
  0x2c   :  { %p573_p5 = scmp.ne.s32.totalorder %s46_s18, %s572_s14  ;;  %p578_p7 = scmp.lt.s32.totalorder %s572_s14, %s572_s14 }
  0x2e   :  { %p579_p8 = por %p578_p7, %p577_p6 }
  0x30   :  { %p580_p9 = pnand %p579_p8, %p573_p5 }
  0x32   :  { %583 = shalt.err (!%p580_p9)
}
  0x33   :  { %51 = dma.hbm_to_vmem [thread:$0]  %s790_s3, 1024, %s46_s18, [#allocation6], %s637_s11, %s637_s11, %s638_s12  }
  0x34   :  { %s641_s16 = smov [#allocation8]   ;;  %s584_s21 = scalar_lea.hbm %s792_s5, 1024 }
  0x35   :  { %s59_s17 = sshll.u32 %s641_s16, 4  ;;  %p585_p10 = scmp.ne.s32.totalorder %s792_s5, %s584_s21  ;;  %s60_s17 = int_to_ptr.vmem [resolvable:$true] %s59_s17 }
  0x36   :  { %p588_p11 = scmp.lt.u32.totalorder %s584_s21, %s792_s5 }
  0x38   :  { %p590_p12 = pnand %p588_p11, %p585_p10 }
  0x3a   :  { %593 = shalt.err (!%p590_p12)
}
  0x3b   :  { %s594_s1 = scalar_lea.vmem %s60_s17, 1024  ;;  %p599_p0 = scmp.lt.s32.totalorder %s60_s17, %s60_s17 }
  0x3c   :  { %p595_p13 = scmp.ne.s32.totalorder %s60_s17, %s594_s1  ;;  %p600_p1 = scmp.lt.s32.totalorder %s594_s1, %s594_s1 }
  0x3e   :  { %p601_p2 = por %p600_p1, %p599_p0 }
  0x40   :  { %p602_p3 = pnand %p601_p2, %p595_p13 }
  0x42   :  { %605 = shalt.err (!%p602_p3)
}
  0x43   :  { %65 = dma.hbm_to_vmem [thread:$0]  %s792_s5, 1024, %s60_s17, [#allocation9], %s637_s11, %s637_s11, %s638_s12  }
  0x44   :  { %628 = dma.done.wait [#allocation3], 32  }
  0x45   :  { %629 = vsyncadd [#allocation3], 4294967264 }
  0x46   :  { %630 = dma.done.wait [#allocation6], 1280  }
  0x47   :  { %631 = vsyncadd [#allocation6], 4294966016 }
  0x48   :  { %632 = dma.done.wait [#allocation9], 1024  }
  0x49   :  { %633 = vsyncadd [#allocation9], 4294966272  ;;  %v642_v0 = vmov 0.0   ;;  %vm643_vm0 = vmmov 0   ;;  %v500_v1 = vld [vmem:[#allocation5] sm:$0xff]   ;;  %v501_v2 = vld [vmem:[#allocation5 + $0x8] sm:$0xff]  }
  0x4a   :  { %443 = vmatprep.subr.bf16.mxu0 %v642_v0  ;;  %447 = vmatprep.mubr.msk.bf16.mxu0 %vm643_vm0, %v642_v0  ;;  %v81_v3 = vld [vmem:[#allocation2] sm:$0x3]  ;;  %v502_v4 = vld [vmem:[#allocation7] sm:$0xff]   ;;  %vm106_vm1 = vcmask 261120   ;;  %v504_v7 = vld [vmem:[#allocation7 + $0x10] sm:$0xff]   ;;  %vm381_vm2 = vcmask 122880  }
  0x4b   :  { %451 = vmatprep.subr.bf16.mxu1 %v642_v0  ;;  %467 = vmatprep.mubr.msk.bf16.mxu1 %vm643_vm0, %v642_v0  ;;  %v82_v5 = vpack.c.bf16 %v81_v3, %v81_v3  ;;  %v503_v6 = vld [vmem:[#allocation7 + $0x8] sm:$0xff]   ;;  %v505_v8 = vld [vmem:[#allocation7 + $0x18] sm:$0xff]   ;;  %v506_v9 = vld [vmem:[#allocation7 + $0x20] sm:$0xff]  }
  0x4c   :  { %444 = vmatpush3.bf16.msra.mxu0 %v500_v1  ;;  %452 = vmatpush3.bf16.msra.mxu1 %v502_v4  ;;  %v507_v10 = vld [vmem:[#allocation7 + $0x28] sm:$0xff]   ;;  %v508_v11 = vld [vmem:[#allocation7 + $0x30] sm:$0xff]   ;;  %v509_v12 = vld [vmem:[#allocation7 + $0x38] sm:$0xff]  }
  0x4d   :  { %445 = vmatprep.subr.bf16.mxu0 %v642_v0  ;;  %453 = vmatprep.subr.bf16.mxu1 %v642_v0  ;;  %v510_v13 = vld [vmem:[#allocation8] sm:$0xff]   ;;  %v511_v14 = vld [vmem:[#allocation8 + $0x8] sm:$0xff]   ;;  %v512_v15 = vld [vmem:[#allocation8 + $0x10] sm:$0xff]  }
  0x4e   :  { %v513_v16 = vld [vmem:[#allocation8 + $0x18] sm:$0xff]   ;;  %v514_v17 = vld [vmem:[#allocation8 + $0x20] sm:$0xff]   ;;  %v515_v18 = vld [vmem:[#allocation8 + $0x28] sm:$0xff]  }
  0x4f   :  { %v400_v19 = vld [vmem:[%s789_s2] ss:$0 sm:$0xff]  ;;  %v516_v28 = vld [vmem:[#allocation8 + $0x30] sm:$0xff]   ;;  %v517_v29 = vld [vmem:[#allocation8 + $0x38] sm:$0xff]  }
  0x50   :  { %446 = vmatpush3.bf16.msra.mxu0 %v501_v2  ;;  %454 = vmatpush3.bf16.msra.mxu1 %v503_v6  ;;  %v404_v30 = vld [vmem:[%s791_s4] ss:$0 sm:$0xff]  ;;  %s644_s4 = smov [#allocation10]  }
  0x51   :  { %471 = vmatprep.subr.bf16.mxu0 %v642_v0  ;;  %455 = vmatprep.subr.bf16.mxu1 %v642_v0  ;;  %v413_v39 = vld [vmem:[%s793_s6] ss:$0 sm:$0xff]  ;;  %s389_s28 = sshll.u32 %s644_s4, 4  ;;  %s390_s28 = int_to_ptr.vmem [resolvable:$true] %s389_s28 }
  0x52   :  { %s606_s29 = scalar_lea.vmem %s390_s28, 16  ;;  %s610_s30 = scalar_lea.vmem %s390_s28, 32 }
  0x53   :  { %448 = vmatmul.mubr.msk.bf16.vlgmr.msra.gmra.mrb[0].mxu0 %vm106_vm1, %v82_v5  ;;  %p607_p4 = scmp.ne.s32.totalorder %s390_s28, %s606_s29  ;;  %p611_p5 = scmp.lt.s32.totalorder %s390_s28, %s390_s28 }
  0x54   :  { %487 = vmatprep.mubr.msk.bf16.mxu0 %vm643_vm0, %v642_v0  ;;  %456 = vmatpush3.bf16.msra.mxu1 %v504_v7  ;;  %p612_p6 = scmp.lt.s32.totalorder %s610_s30, %s606_s29 }
  0x55   :  { %457 = vmatprep.subr.bf16.mxu1 %v642_v0  ;;  %472 = vmatpush3.bf16.msra.mxu0 %v510_v13 }
  0x56   :  { %473 = vmatprep.subr.bf16.mxu0 %v642_v0  ;;  %p613_p7 = por %p612_p6, %p611_p5 }
  0x58   :  { %458 = vmatpush3.bf16.msra.mxu1 %v505_v8  ;;  %p614_p8 = pnand %p613_p7, %p607_p4 }
  0x59   :  { %459 = vmatprep.subr.bf16.mxu1 %v642_v0  ;;  %474 = vmatpush3.bf16.msra.mxu0 %v511_v14 }
  0x5a   :  { %475 = vmatprep.subr.bf16.mxu0 %v642_v0 }
  0x5c   :  { %460 = vmatpush3.bf16.msra.mxu1 %v506_v9 }
  0x5d   :  { %461 = vmatprep.subr.bf16.mxu1 %v642_v0  ;;  %476 = vmatpush3.bf16.msra.mxu0 %v512_v15 }
  0x5e   :  { %477 = vmatprep.subr.bf16.mxu0 %v642_v0 }
  0x60   :  { %462 = vmatpush3.bf16.msra.mxu1 %v507_v10 }
  0x61   :  { %463 = vmatprep.subr.bf16.mxu1 %v642_v0  ;;  %478 = vmatpush3.bf16.msra.mxu0 %v513_v16 }
  0x62   :  { %479 = vmatprep.subr.bf16.mxu0 %v642_v0 }
  0x64   :  { %464 = vmatpush3.bf16.msra.mxu1 %v508_v11 }
  0x65   :  { %465 = vmatprep.subr.bf16.mxu1 %v642_v0  ;;  %480 = vmatpush3.bf16.msra.mxu0 %v514_v17 }
  0x66   :  { %481 = vmatprep.subr.bf16.mxu0 %v642_v0 }
  0x68   :  { %466 = vmatpush3.bf16.msra.mxu1 %v509_v12 }
  0x69   :  { %482 = vmatpush3.bf16.msra.mxu0 %v515_v18 }
  0x6a   :  { %483 = vmatprep.subr.bf16.mxu0 %v642_v0 }
  0x6d   :  { %484 = vmatpush3.bf16.msra.mxu0 %v516_v28 }
  0x6e   :  { %485 = vmatprep.subr.bf16.mxu0 %v642_v0 }
  0x71   :  { %486 = vmatpush3.bf16.msra.mxu0 %v517_v29 }
 0x126   :  { %v144_v20 = vpop.f32.mrb[0].mxu0 }
 0x127   :  { %v145_v21 = vadd.f32 %v400_v19, %v144_v20  ;;  %v449_v22 = vpop.f32.mrb[1].mxu0 }
 0x128   :  { %v147_v23 = vpop.f32.mrb[2].mxu0 }
 0x129   :  { %v150_v24 = vmul.f32 0.01, %v145_v21  ;;  %v450_v25 = vpop.f32.mrb[3].mxu0 }
 0x12b   :  { %v151_v26 = vmax.f32 %v145_v21, %v150_v24 }
 0x12d   :  { %v152_v27 = vpack.c.bf16 %v151_v26, %v151_v26 }
 0x12f   :  { %468 = vmatmul.mubr.bf16.vlgmr.msra.gmra.mrb[0].mxu1 %v152_v27 }
 0x202   :  { %v258_v31 = vpop.f32.mrb[0].mxu1 }
 0x203   :  { %v259_v32 = vadd.f32 %v404_v30, %v258_v31  ;;  %v469_v33 = vpop.f32.mrb[1].mxu1 }
 0x204   :  { %v261_v34 = vpop.f32.mrb[2].mxu1 }
 0x205   :  { %v264_v35 = vmul.f32 0.01, %v259_v32  ;;  %v470_v36 = vpop.f32.mrb[3].mxu1 }
 0x207   :  { %v265_v37 = vmax.f32 %v259_v32, %v264_v35 }
 0x209   :  { %v266_v38 = vpack.c.bf16 %v265_v37, %v265_v37 }
 0x20b   :  { %488 = vmatmul.mubr.bf16.vlgmr.msra.gmra.mrb[4].mxu0 %v266_v38 }
 0x2de   :  { %v372_v40 = vpop.f32.mrb[4].mxu0 }
 0x2df   :  { %v373_v41 = vadd.f32 %v413_v39, %v372_v40  ;;  %v489_v42 = vpop.f32.mrb[5].mxu0 }
 0x2e0   :  { %v375_v43 = vpop.f32.mrb[6].mxu0 }
 0x2e1   :  { %v378_v44 = vmul.f32 0.01, %v373_v41  ;;  %v490_v45 = vpop.f32.mrb[7].mxu0 }
 0x2e3   :  { %v379_v46 = vmax.f32 %v373_v41, %v378_v44 }
 0x2e5   :  { %v380_v47 = vpack.c.bf16 %v379_v46, %v379_v46 }
 0x2e7   :  { %382 = vst.msk [vmem:[#allocation10] sm:$0x1] %vm381_vm2, %v380_v47 }
 0x2e8   :  { %617 = shalt.err (!%p614_p8)
}
 0x2e9   :  { %s618_s9 = scalar_lea.hbm %s794_s7, 16 }
 0x2ea   :  { %p619_p9 = scmp.ne.s32.totalorder %s794_s7, %s618_s9  ;;  %p622_p10 = scmp.lt.u32.totalorder %s618_s9, %s794_s7 }
 0x2ec   :  { %p624_p11 = pnand %p622_p10, %p619_p9 }
 0x2ee   :  { %627 = shalt.err (!%p624_p11)
}
 0x2ef   :  { %392 = dma.vmem_to_hbm [thread:$0]  %s390_s28, 16, %s794_s7, [#allocation4]  }
 0x2f0   :  { %634 = dma.done.wait [#allocation4], 16  }
 0x2f1   :  { %635 = vsyncadd [#allocation4], 4294967280 }
 0x2f2   :  { %396 = vsyncpa [#allocation3], 1 }
 0x2f3   :  { %397 = vsyncpa [#allocation6], 1 }
 0x2f4   :  { %398 = vsyncpa [#allocation9], 1 }
 0x2f5   :  { %399 = vsyncpa [#allocation4], 1 }

</bundles_post_ra>
